<compile_context>
chip_gen: v7x
topology: tpu7x:2x2x1
jax: 0.10.0
libtpu: 0.0.40
codegen_flags: <defaults>
</compile_context>

<pallas_src>
import functools

import jax
import jax.numpy as jnp
from jax.experimental import pallas as pl
from jax.experimental.pallas import tpu as pltpu


def _make_mha_kernel(heads: int, d_kq: int, d_v: int, compute_dtype, has_mask: bool):
    per = 2 * d_kq + d_v

    def kernel(*refs):
        if has_mask:
            x_ref, mask_ref, wqkv_ref, bqkv_ref, wo_ref, bo_ref, out_ref = refs
        else:
            x_ref, wqkv_ref, bqkv_ref, wo_ref, bo_ref, out_ref = refs
            mask_ref = None

        tb, n, d = x_ref.shape
        x2 = x_ref[...].reshape(tb * n, d)              # (rows, D), compute_dtype

        # Fused QKV projection: one lane-dense (rows, D) @ (D, H*per) matmul with
        # fp32 accumulation.  1/sqrt(d_kq) is already folded into the Q columns.
        qkv = jnp.dot(x2, wqkv_ref[...],
                      preferred_element_type=jnp.float32) + bqkv_ref[...]

        if has_mask:
            # Hoisted: one (TB, N, N) broadcast instead of one per head.
            mask_b = jnp.broadcast_to(mask_ref[...][None, :, :], (tb, n, n))

        vals = []
        for h in range(heads):                          # static unroll (small H)
            base = h * per
            q = qkv[:, base:base + d_kq].reshape(tb, n, d_kq).astype(compute_dtype)
            k = qkv[:, base + d_kq:base + 2 * d_kq].reshape(tb, n, d_kq).astype(compute_dtype)
            v = qkv[:, base + 2 * d_kq:base + per].reshape(tb, n, d_v).astype(compute_dtype)

            # batched attention over the TB axis (supported flash pattern)
            logits = jnp.einsum('bnk,bmk->bnm', q, k,
                                preferred_element_type=jnp.float32)
            if has_mask:
                logits = logits + mask_b
            m = jnp.max(logits, axis=-1, keepdims=True)
            e = jnp.exp(logits - m)
            s = jnp.sum(e, axis=-1, keepdims=True)
            w = e * pl.reciprocal(s, approx=True)       # EUP slot, frees VALU divide
            vals.append(
                jnp.einsum('bnm,bmv->bnv', w.astype(compute_dtype), v,
                           preferred_element_type=jnp.float32).reshape(tb * n, d_v))

        # Fused output projection: single contraction of depth H*d_v.
        vals_all = jnp.concatenate(vals, axis=-1).astype(compute_dtype)
        out = jnp.dot(vals_all, wo_ref[...],
                      preferred_element_type=jnp.float32) + bo_ref[...]
        out_ref[...] = out.reshape(tb, n, d).astype(out_ref.dtype)

    return kernel


@functools.partial(jax.jit,
                   static_argnames=("heads", "d_kq", "d_v", "compute_dtype", "block_b"))
def multi_head_attention_pallas(stream_nbd, mask, params, *, heads, d_kq, d_v,
                                compute_dtype=jnp.bfloat16, block_b=None):
    """stream_nbd: (N, B, D); mask: (N, N) or None; params in PyTorch layout."""
    n, b, d = stream_nbd.shape
    per = 2 * d_kq + d_v
    hper = heads * per
    has_mask = mask is not None

    # ---- weight prep (PyTorch layout -> matmul-ready, scale folded into Q) ----
    scale = 1.0 / (d_kq ** 0.5)
    col_scale = jnp.tile(
        jnp.concatenate([jnp.full((d_kq,), scale, jnp.float32),
                         jnp.ones((d_kq + d_v,), jnp.float32)]), heads)        # (H*per,)
    wqkv_t = (params["wqkv"].astype(jnp.float32).T
              * col_scale[None, :]).astype(compute_dtype)                       # (D, H*per)
    bqkv = (params["bqkv"].astype(jnp.float32) * col_scale).reshape(1, hper)    # fp32
    wo2 = params["wout"].astype(jnp.float32).T.astype(compute_dtype)            # (H*d_v, D)
    bo = params["bout"].astype(jnp.float32).reshape(1, d)                       # fp32

    # ---- activations: batch-major + compute dtype (transpose+cast fuse under jit) ----
    x = jnp.transpose(stream_nbd, (1, 0, 2)).astype(compute_dtype)              # (B, N, D)

    if block_b is None:
        block_b = max(1, min(b, 512 // max(n, 1)))        # ~512 rows per slab
        if b >= 2:                                        # >= 2 steps -> both v7x TCs
            block_b = min(block_b, (b + 1) // 2)
    n_steps = -(-b // block_b)
    b_pad = n_steps * block_b
    if b_pad != b:
        x = jnp.pad(x, ((0, b_pad - b), (0, 0), (0, 0)))

    # ---- explicit VMEM budget (v7x: 64 MiB physical / 32 MiB default scoped) ----
    rows = block_b * n
    isz = jnp.dtype(compute_dtype).itemsize
    est = (2 * rows * d * (isz + 4)                       # x + out blocks (dbl-buffered)
           + 2 * (d * hper * isz + hper * 4)              # qkv weight + bias
           + 2 * (heads * d_v * d * isz + d * 4)          # out-proj weight + bias
           + 2 * n * n * 4                                # mask
           + rows * hper * 4                              # fused qkv activations
           + 2 * block_b * n * n * 4                      # logits + hoisted mask
           + 2 * rows * heads * d_v * 4)                  # per-head vals + concat
    vmem_limit = int(min(max(4 * est, 32 * 1024 * 1024), 48 * 1024 * 1024))

    def _const_spec(a):
        nd = a.ndim
        return pl.BlockSpec(a.shape, lambda i, _nd=nd: (0,) * _nd)

    operands = [x]
    in_specs = [pl.BlockSpec((block_b, n, d), lambda i: (i, 0, 0))]
    if has_mask:
        mask_f = mask.astype(jnp.float32)
        operands.append(mask_f)
        in_specs.append(_const_spec(mask_f))
    for wgt in (wqkv_t, bqkv, wo2, bo):
        operands.append(wgt)
        in_specs.append(_const_spec(wgt))

    kernel = _make_mha_kernel(heads, d_kq, d_v, compute_dtype, has_mask)
    out = pl.pallas_call(
        kernel,
        out_shape=jax.ShapeDtypeStruct((b_pad, n, d), jnp.float32),
        grid_spec=pltpu.PrefetchScalarGridSpec(
            num_scalar_prefetch=0,
            grid=(n_steps,),
            in_specs=in_specs,
            out_specs=pl.BlockSpec((block_b, n, d), lambda i: (i, 0, 0))),
        compiler_params=pltpu.CompilerParams(
            dimension_semantics=("parallel",),
            vmem_limit_bytes=vmem_limit),
    )(*operands)

    return jnp.transpose(out[:b], (1, 0, 2))               # back to (N, B, D)


# ----------------------- pure-JAX reference (mirrors the PyTorch code) -------
def _ref_mha(stream, mask, params, heads, d_kq, d_v):
    n, b, d = stream.shape
    per = 2 * d_kq + d_v
    qkv = (stream.reshape(n * b, d) @ params["wqkv"].T + params["bqkv"]
           ).reshape(n, b * heads, per)
    q = qkv[..., :d_kq]
    k = qkv[..., d_kq:2 * d_kq]
    v = qkv[..., 2 * d_kq:]
    logits = jnp.einsum("ihk,jhk->hij", q, k) / (d_kq ** 0.5)
    if mask is not None:
        logits = logits + mask
    w = jax.nn.softmax(logits, -1)
    vals = jnp.einsum("hij,jhv->ihv", w, v)
    out = vals.reshape(n * b, heads * d_v) @ params["wout"].T + params["bout"]
    return out.reshape(n, b, d)


if __name__ == "__main__":
    heads, d_kq, d_v = 4, 8, 8
    d_stream = 32
    seq_n, batch_b = 8, 2
    per = 2 * d_kq + d_v

    key = jax.random.PRNGKey(0)
    k_in, k0, k1, k2, k3 = jax.random.split(key, 5)
    stream = jax.random.normal(k_in, (seq_n, batch_b, d_stream), jnp.float32)
    params = dict(
        wqkv=0.1 * jax.random.normal(k0, (heads * per, d_stream), jnp.float32),
        bqkv=0.1 * jax.random.normal(k1, (heads * per,), jnp.float32),
        wout=0.1 * jax.random.normal(k2, (d_stream, heads * d_v), jnp.float32),
        bout=0.1 * jax.random.normal(k3, (d_stream,), jnp.float32),
    )

    causal = jnp.tril(jnp.ones((seq_n, seq_n), jnp.bool_))
    mask = jnp.where(causal, 0.0, -1e9).astype(jnp.float32)

    ref = _ref_mha(stream, mask, params, heads, d_kq, d_v)
    ref_nomask = _ref_mha(stream, None, params, heads, d_kq, d_v)

    # fp32 operands (tight check; approx reciprocal adds ~1e-4 rel error)
    out_f32 = multi_head_attention_pallas(stream, mask, params, heads=heads,
                                          d_kq=d_kq, d_v=d_v,
                                          compute_dtype=jnp.float32)
    out_f32 = jax.block_until_ready(out_f32)
    assert out_f32.shape == (seq_n, batch_b, d_stream)
    assert jnp.allclose(out_f32, ref, atol=5e-3, rtol=5e-3), "fp32 mismatch vs reference"

    # default bf16 matmul operands (MXU-native), fp32 accumulation — looser check
    out_bf16 = multi_head_attention_pallas(stream, mask, params, heads=heads,
                                           d_kq=d_kq, d_v=d_v,
                                           compute_dtype=jnp.bfloat16)
    out_bf16 = jax.block_until_ready(out_bf16)
    assert jnp.allclose(out_bf16, ref, atol=5e-2, rtol=5e-2), "bf16 mismatch vs reference"

    # mask=None specialization (no mask input, no N^2 add in-kernel)
    out_nm = multi_head_attention_pallas(stream, None, params, heads=heads,
                                         d_kq=d_kq, d_v=d_v,
                                         compute_dtype=jnp.float32)
    out_nm = jax.block_until_ready(out_nm)
    assert jnp.allclose(out_nm, ref_nomask, atol=5e-3, rtol=5e-3), "no-mask mismatch vs reference"

    print("KERNEL_OK")
</pallas_src>

<mosaic_0001>
module attributes {stable_mosaic.version = 11 : i64} {
  func.func @kernel(%arg0: i32, %arg1: memref<1x8x32xf32, #tpu.memory_space<vmem>>, %arg2: memref<8x8xf32, #tpu.memory_space<vmem>>, %arg3: memref<32x96xf32, #tpu.memory_space<vmem>>, %arg4: memref<1x96xf32, #tpu.memory_space<vmem>>, %arg5: memref<32x32xf32, #tpu.memory_space<vmem>>, %arg6: memref<1x32xf32, #tpu.memory_space<vmem>>, %arg7: memref<1x8x32xf32, #tpu.memory_space<vmem>>) attributes {dimension_semantics = [#tpu.dimension_semantics<parallel>], iteration_bounds = array<i64: 2>, scalar_prefetch = 0 : i64, scratch_operands = 0 : i64, tpu.core_type = #tpu.core_type<tc>, window_params = [{transform_indices = @transform_0, window_bounds = array<i64: 1, 8, 32>}, {pipeline_mode = #tpu.pipeline_mode<synchronous>, transform_indices = @transform_1, window_bounds = array<i64: 8, 8>}, {pipeline_mode = #tpu.pipeline_mode<synchronous>, transform_indices = @transform_2, window_bounds = array<i64: 32, 96>}, {pipeline_mode = #tpu.pipeline_mode<synchronous>, transform_indices = @transform_3, window_bounds = array<i64: 1, 96>}, {pipeline_mode = #tpu.pipeline_mode<synchronous>, transform_indices = @transform_4, window_bounds = array<i64: 32, 32>}, {pipeline_mode = #tpu.pipeline_mode<synchronous>, transform_indices = @transform_5, window_bounds = array<i64: 1, 32>}, {transform_indices = @transform_6, window_bounds = array<i64: 1, 8, 32>}]} {
    %c0 = arith.constant 0 : index
    %c0_0 = arith.constant 0 : index
    %c0_1 = arith.constant 0 : index
    %0 = vector.load %arg1[%c0, %c0_0, %c0_1] : memref<1x8x32xf32, #tpu.memory_space<vmem>>, vector<1x8x32xf32>
    %1 = vector.shape_cast %0 : vector<1x8x32xf32> to vector<8x32xf32>
    %c0_2 = arith.constant 0 : index
    %c0_3 = arith.constant 0 : index
    %2 = vector.load %arg3[%c0_2, %c0_3] : memref<32x96xf32, #tpu.memory_space<vmem>>, vector<32x96xf32>
    %cst = arith.constant dense<0.000000e+00> : vector<8x96xf32>
    %3 = tpu.matmul %1, %2, %cst {dimension_numbers = #tpu.dot_dimension_numbers<[1], [0], [0], [1], [0, 0, 1, 1], [], []>} : vector<8x32xf32>, vector<32x96xf32>, vector<8x96xf32> -> vector<8x96xf32>
    %c0_4 = arith.constant 0 : index
    %c0_5 = arith.constant 0 : index
    %4 = vector.load %arg4[%c0_4, %c0_5] : memref<1x96xf32, #tpu.memory_space<vmem>>, vector<1x96xf32>
    %5 = vector.broadcast %4 : vector<1x96xf32> to vector<8x96xf32>
    %6 = arith.addf %3, %5 : vector<8x96xf32>
    %c0_6 = arith.constant 0 : index
    %c0_7 = arith.constant 0 : index
    %7 = vector.load %arg2[%c0_6, %c0_7] : memref<8x8xf32, #tpu.memory_space<vmem>>, vector<8x8xf32>
    %8 = vector.shape_cast %7 : vector<8x8xf32> to vector<1x8x8xf32>
    %9 = vector.extract_strided_slice %6 {offsets = [0, 0], sizes = [8, 8], strides = [1, 1]} : vector<8x96xf32> to vector<8x8xf32>
    %10 = vector.shape_cast %9 : vector<8x8xf32> to vector<1x8x8xf32>
    %11 = vector.extract_strided_slice %6 {offsets = [0, 8], sizes = [8, 8], strides = [1, 1]} : vector<8x96xf32> to vector<8x8xf32>
    %12 = vector.shape_cast %11 : vector<8x8xf32> to vector<1x8x8xf32>
    %13 = vector.extract_strided_slice %6 {offsets = [0, 16], sizes = [8, 8], strides = [1, 1]} : vector<8x96xf32> to vector<8x8xf32>
    %14 = vector.shape_cast %13 : vector<8x8xf32> to vector<1x8x8xf32>
    "tpu.trace_start"() <{level = 10 : i32, message = "bnk,bmk->bnm"}> : () -> ()
    %cst_8 = arith.constant dense<0.000000e+00> : vector<1x8x8xf32>
    %15 = tpu.matmul %10, %12, %cst_8 {dimension_numbers = #tpu.dot_dimension_numbers<[2], [2], [1], [1], [0, 0, 0, 1, 1, 1], [0], [0]>} : vector<1x8x8xf32>, vector<1x8x8xf32>, vector<1x8x8xf32> -> vector<1x8x8xf32>
    "tpu.trace_stop"() : () -> ()
    %16 = arith.addf %15, %8 : vector<1x8x8xf32>
    %cst_9 = arith.constant dense<0xFF800000> : vector<1x8xf32>
    %17 = vector.multi_reduction <maximumf>, %16, %cst_9 [2] : vector<1x8x8xf32> to vector<1x8xf32>
    %18 = vector.shape_cast %17 : vector<1x8xf32> to vector<1x8x1xf32>
    %19 = vector.broadcast %18 : vector<1x8x1xf32> to vector<1x8x8xf32>
    %20 = arith.subf %16, %19 : vector<1x8x8xf32>
    %21 = math.exp %20 : vector<1x8x8xf32>
    %cst_10 = arith.constant dense<0.000000e+00> : vector<1x8xf32>
    %22 = vector.multi_reduction <add>, %21, %cst_10 [2] : vector<1x8x8xf32> to vector<1x8xf32>
    %23 = vector.shape_cast %22 : vector<1x8xf32> to vector<1x8x1xf32>
    %24 = tpu.reciprocal %23 {approx = true} : vector<1x8x1xf32> -> vector<1x8x1xf32>
    %25 = vector.broadcast %24 : vector<1x8x1xf32> to vector<1x8x8xf32>
    %26 = arith.mulf %21, %25 : vector<1x8x8xf32>
    "tpu.trace_start"() <{level = 10 : i32, message = "bnm,bmv->bnv"}> : () -> ()
    %cst_11 = arith.constant dense<0.000000e+00> : vector<1x8x8xf32>
    %27 = tpu.matmul %26, %14, %cst_11 {dimension_numbers = #tpu.dot_dimension_numbers<[2], [1], [1], [2], [0, 0, 0, 1, 1, 2], [0], [0]>} : vector<1x8x8xf32>, vector<1x8x8xf32>, vector<1x8x8xf32> -> vector<1x8x8xf32>
    "tpu.trace_stop"() : () -> ()
    %28 = vector.shape_cast %27 : vector<1x8x8xf32> to vector<8x8xf32>
    %29 = vector.extract_strided_slice %6 {offsets = [0, 24], sizes = [8, 8], strides = [1, 1]} : vector<8x96xf32> to vector<8x8xf32>
    %30 = vector.shape_cast %29 : vector<8x8xf32> to vector<1x8x8xf32>
    %31 = vector.extract_strided_slice %6 {offsets = [0, 32], sizes = [8, 8], strides = [1, 1]} : vector<8x96xf32> to vector<8x8xf32>
    %32 = vector.shape_cast %31 : vector<8x8xf32> to vector<1x8x8xf32>
    %33 = vector.extract_strided_slice %6 {offsets = [0, 40], sizes = [8, 8], strides = [1, 1]} : vector<8x96xf32> to vector<8x8xf32>
    %34 = vector.shape_cast %33 : vector<8x8xf32> to vector<1x8x8xf32>
    "tpu.trace_start"() <{level = 10 : i32, message = "bnk,bmk->bnm"}> : () -> ()
    %cst_12 = arith.constant dense<0.000000e+00> : vector<1x8x8xf32>
    %35 = tpu.matmul %30, %32, %cst_12 {dimension_numbers = #tpu.dot_dimension_numbers<[2], [2], [1], [1], [0, 0, 0, 1, 1, 1], [0], [0]>} : vector<1x8x8xf32>, vector<1x8x8xf32>, vector<1x8x8xf32> -> vector<1x8x8xf32>
    "tpu.trace_stop"() : () -> ()
    %36 = arith.addf %35, %8 : vector<1x8x8xf32>
    %cst_13 = arith.constant dense<0xFF800000> : vector<1x8xf32>
    %37 = vector.multi_reduction <maximumf>, %36, %cst_13 [2] : vector<1x8x8xf32> to vector<1x8xf32>
    %38 = vector.shape_cast %37 : vector<1x8xf32> to vector<1x8x1xf32>
    %39 = vector.broadcast %38 : vector<1x8x1xf32> to vector<1x8x8xf32>
    %40 = arith.subf %36, %39 : vector<1x8x8xf32>
    %41 = math.exp %40 : vector<1x8x8xf32>
    %cst_14 = arith.constant dense<0.000000e+00> : vector<1x8xf32>
    %42 = vector.multi_reduction <add>, %41, %cst_14 [2] : vector<1x8x8xf32> to vector<1x8xf32>
    %43 = vector.shape_cast %42 : vector<1x8xf32> to vector<1x8x1xf32>
    %44 = tpu.reciprocal %43 {approx = true} : vector<1x8x1xf32> -> vector<1x8x1xf32>
    %45 = vector.broadcast %44 : vector<1x8x1xf32> to vector<1x8x8xf32>
    %46 = arith.mulf %41, %45 : vector<1x8x8xf32>
    "tpu.trace_start"() <{level = 10 : i32, message = "bnm,bmv->bnv"}> : () -> ()
    %cst_15 = arith.constant dense<0.000000e+00> : vector<1x8x8xf32>
    %47 = tpu.matmul %46, %34, %cst_15 {dimension_numbers = #tpu.dot_dimension_numbers<[2], [1], [1], [2], [0, 0, 0, 1, 1, 2], [0], [0]>} : vector<1x8x8xf32>, vector<1x8x8xf32>, vector<1x8x8xf32> -> vector<1x8x8xf32>
    "tpu.trace_stop"() : () -> ()
    %48 = vector.shape_cast %47 : vector<1x8x8xf32> to vector<8x8xf32>
    %49 = vector.extract_strided_slice %6 {offsets = [0, 48], sizes = [8, 8], strides = [1, 1]} : vector<8x96xf32> to vector<8x8xf32>
    %50 = vector.shape_cast %49 : vector<8x8xf32> to vector<1x8x8xf32>
    %51 = vector.extract_strided_slice %6 {offsets = [0, 56], sizes = [8, 8], strides = [1, 1]} : vector<8x96xf32> to vector<8x8xf32>
    %52 = vector.shape_cast %51 : vector<8x8xf32> to vector<1x8x8xf32>
    %53 = vector.extract_strided_slice %6 {offsets = [0, 64], sizes = [8, 8], strides = [1, 1]} : vector<8x96xf32> to vector<8x8xf32>
    %54 = vector.shape_cast %53 : vector<8x8xf32> to vector<1x8x8xf32>
    "tpu.trace_start"() <{level = 10 : i32, message = "bnk,bmk->bnm"}> : () -> ()
    %cst_16 = arith.constant dense<0.000000e+00> : vector<1x8x8xf32>
    %55 = tpu.matmul %50, %52, %cst_16 {dimension_numbers = #tpu.dot_dimension_numbers<[2], [2], [1], [1], [0, 0, 0, 1, 1, 1], [0], [0]>} : vector<1x8x8xf32>, vector<1x8x8xf32>, vector<1x8x8xf32> -> vector<1x8x8xf32>
    "tpu.trace_stop"() : () -> ()
    %56 = arith.addf %55, %8 : vector<1x8x8xf32>
    %cst_17 = arith.constant dense<0xFF800000> : vector<1x8xf32>
    %57 = vector.multi_reduction <maximumf>, %56, %cst_17 [2] : vector<1x8x8xf32> to vector<1x8xf32>
    %58 = vector.shape_cast %57 : vector<1x8xf32> to vector<1x8x1xf32>
    %59 = vector.broadcast %58 : vector<1x8x1xf32> to vector<1x8x8xf32>
    %60 = arith.subf %56, %59 : vector<1x8x8xf32>
    %61 = math.exp %60 : vector<1x8x8xf32>
    %cst_18 = arith.constant dense<0.000000e+00> : vector<1x8xf32>
    %62 = vector.multi_reduction <add>, %61, %cst_18 [2] : vector<1x8x8xf32> to vector<1x8xf32>
    %63 = vector.shape_cast %62 : vector<1x8xf32> to vector<1x8x1xf32>
    %64 = tpu.reciprocal %63 {approx = true} : vector<1x8x1xf32> -> vector<1x8x1xf32>
    %65 = vector.broadcast %64 : vector<1x8x1xf32> to vector<1x8x8xf32>
    %66 = arith.mulf %61, %65 : vector<1x8x8xf32>
    "tpu.trace_start"() <{level = 10 : i32, message = "bnm,bmv->bnv"}> : () -> ()
    %cst_19 = arith.constant dense<0.000000e+00> : vector<1x8x8xf32>
    %67 = tpu.matmul %66, %54, %cst_19 {dimension_numbers = #tpu.dot_dimension_numbers<[2], [1], [1], [2], [0, 0, 0, 1, 1, 2], [0], [0]>} : vector<1x8x8xf32>, vector<1x8x8xf32>, vector<1x8x8xf32> -> vector<1x8x8xf32>
    "tpu.trace_stop"() : () -> ()
    %68 = vector.shape_cast %67 : vector<1x8x8xf32> to vector<8x8xf32>
    %69 = vector.extract_strided_slice %6 {offsets = [0, 72], sizes = [8, 8], strides = [1, 1]} : vector<8x96xf32> to vector<8x8xf32>
    %70 = vector.shape_cast %69 : vector<8x8xf32> to vector<1x8x8xf32>
    %71 = vector.extract_strided_slice %6 {offsets = [0, 80], sizes = [8, 8], strides = [1, 1]} : vector<8x96xf32> to vector<8x8xf32>
    %72 = vector.shape_cast %71 : vector<8x8xf32> to vector<1x8x8xf32>
    %73 = vector.extract_strided_slice %6 {offsets = [0, 88], sizes = [8, 8], strides = [1, 1]} : vector<8x96xf32> to vector<8x8xf32>
    %74 = vector.shape_cast %73 : vector<8x8xf32> to vector<1x8x8xf32>
    "tpu.trace_start"() <{level = 10 : i32, message = "bnk,bmk->bnm"}> : () -> ()
    %cst_20 = arith.constant dense<0.000000e+00> : vector<1x8x8xf32>
    %75 = tpu.matmul %70, %72, %cst_20 {dimension_numbers = #tpu.dot_dimension_numbers<[2], [2], [1], [1], [0, 0, 0, 1, 1, 1], [0], [0]>} : vector<1x8x8xf32>, vector<1x8x8xf32>, vector<1x8x8xf32> -> vector<1x8x8xf32>
    "tpu.trace_stop"() : () -> ()
    %76 = arith.addf %75, %8 : vector<1x8x8xf32>
    %cst_21 = arith.constant dense<0xFF800000> : vector<1x8xf32>
    %77 = vector.multi_reduction <maximumf>, %76, %cst_21 [2] : vector<1x8x8xf32> to vector<1x8xf32>
    %78 = vector.shape_cast %77 : vector<1x8xf32> to vector<1x8x1xf32>
    %79 = vector.broadcast %78 : vector<1x8x1xf32> to vector<1x8x8xf32>
    %80 = arith.subf %76, %79 : vector<1x8x8xf32>
    %81 = math.exp %80 : vector<1x8x8xf32>
    %cst_22 = arith.constant dense<0.000000e+00> : vector<1x8xf32>
    %82 = vector.multi_reduction <add>, %81, %cst_22 [2] : vector<1x8x8xf32> to vector<1x8xf32>
    %83 = vector.shape_cast %82 : vector<1x8xf32> to vector<1x8x1xf32>
    %84 = tpu.reciprocal %83 {approx = true} : vector<1x8x1xf32> -> vector<1x8x1xf32>
    %85 = vector.broadcast %84 : vector<1x8x1xf32> to vector<1x8x8xf32>
    %86 = arith.mulf %81, %85 : vector<1x8x8xf32>
    "tpu.trace_start"() <{level = 10 : i32, message = "bnm,bmv->bnv"}> : () -> ()
    %cst_23 = arith.constant dense<0.000000e+00> : vector<1x8x8xf32>
    %87 = tpu.matmul %86, %74, %cst_23 {dimension_numbers = #tpu.dot_dimension_numbers<[2], [1], [1], [2], [0, 0, 0, 1, 1, 2], [0], [0]>} : vector<1x8x8xf32>, vector<1x8x8xf32>, vector<1x8x8xf32> -> vector<1x8x8xf32>
    "tpu.trace_stop"() : () -> ()
    %88 = vector.shape_cast %87 : vector<1x8x8xf32> to vector<8x8xf32>
    %89 = tpu.concatenate %28, %48, %68, %88 in 1 : vector<8x8xf32>, vector<8x8xf32>, vector<8x8xf32>, vector<8x8xf32> -> vector<8x32xf32>
    %c0_24 = arith.constant 0 : index
    %c0_25 = arith.constant 0 : index
    %90 = vector.load %arg5[%c0_24, %c0_25] : memref<32x32xf32, #tpu.memory_space<vmem>>, vector<32x32xf32>
    %cst_26 = arith.constant dense<0.000000e+00> : vector<8x32xf32>
    %91 = tpu.matmul %89, %90, %cst_26 {dimension_numbers = #tpu.dot_dimension_numbers<[1], [0], [0], [1], [0, 0, 1, 1], [], []>} : vector<8x32xf32>, vector<32x32xf32>, vector<8x32xf32> -> vector<8x32xf32>
    %c0_27 = arith.constant 0 : index
    %c0_28 = arith.constant 0 : index
    %92 = vector.load %arg6[%c0_27, %c0_28] : memref<1x32xf32, #tpu.memory_space<vmem>>, vector<1x32xf32>
    %93 = vector.broadcast %92 : vector<1x32xf32> to vector<8x32xf32>
    %94 = arith.addf %91, %93 : vector<8x32xf32>
    %95 = vector.shape_cast %94 : vector<8x32xf32> to vector<1x8x32xf32>
    %c0_29 = arith.constant 0 : index
    %c0_30 = arith.constant 0 : index
    %c0_31 = arith.constant 0 : index
    %96 = vector.load %arg7[%c0_29, %c0_30, %c0_31] : memref<1x8x32xf32, #tpu.memory_space<vmem>>, vector<1x8x32xf32>
    tpu.vector_store %arg7[%c0_29, %c0_30, %c0_31], %95 {strides = array<i32>} : memref<1x8x32xf32, #tpu.memory_space<vmem>>, vector<1x8x32xf32>,
    return
  }
  func.func @transform_0(%arg0: i32) -> (i32, i32, i32) {
    %c0_i32 = arith.constant 0 : i32
    %c0_i32_0 = arith.constant 0 : i32
    %c0_i32_1 = arith.constant 0 : i32
    return %arg0, %c0_i32, %c0_i32_0 : i32, i32, i32
  }
  func.func @transform_1(%arg0: i32) -> (i32, i32) {
    %c0_i32 = arith.constant 0 : i32
    %c0_i32_0 = arith.constant 0 : i32
    %c0_i32_1 = arith.constant 0 : i32
    return %c0_i32, %c0_i32_0 : i32, i32
  }
  func.func @transform_2(%arg0: i32) -> (i32, i32) {
    %c0_i32 = arith.constant 0 : i32
    %c0_i32_0 = arith.constant 0 : i32
    %c0_i32_1 = arith.constant 0 : i32
    return %c0_i32, %c0_i32_0 : i32, i32
  }
  func.func @transform_3(%arg0: i32) -> (i32, i32) {
    %c0_i32 = arith.constant 0 : i32
    %c0_i32_0 = arith.constant 0 : i32
    %c0_i32_1 = arith.constant 0 : i32
    return %c0_i32, %c0_i32_0 : i32, i32
  }
  func.func @transform_4(%arg0: i32) -> (i32, i32) {
    %c0_i32 = arith.constant 0 : i32
    %c0_i32_0 = arith.constant 0 : i32
    %c0_i32_1 = arith.constant 0 : i32
    return %c0_i32, %c0_i32_0 : i32, i32
  }
  func.func @transform_5(%arg0: i32) -> (i32, i32) {
    %c0_i32 = arith.constant 0 : i32
    %c0_i32_0 = arith.constant 0 : i32
    %c0_i32_1 = arith.constant 0 : i32
    return %c0_i32, %c0_i32_0 : i32, i32
  }
  func.func @transform_6(%arg0: i32) -> (i32, i32, i32) {
    %c0_i32 = arith.constant 0 : i32
    %c0_i32_0 = arith.constant 0 : i32
    %c0_i32_1 = arith.constant 0 : i32
    return %arg0, %c0_i32, %c0_i32_0 : i32, i32, i32
  }
}

</mosaic_0001>

<bundles_post_ra>
// kernel: mul.6
= control target key start
LH: loop header
LB: loop body
LE: loop exit
PB: predicated region body
PF: predicated region fallthrough
CT: control target
= control target key end

     0   :  { %vm7_vm0 = vcmask 195584   ;;  %s37_s8 = smov 24   ;;  %s38_s9 = smov 48   ;;  %vm13_vm1 = vcmask 785984   ;;  %vm19_vm2 = vcmask 589184   ;;  %vm25_vm3 = vcmask 392384   ;;  %s55_s0 = inlined_call_operand.vmem [shape: f32[4,24], index: 0, kind: input, shape index: {}]   ;;  %s56_s1 = inlined_call_operand.vmem [shape: f32[96], index: 1, kind: output, shape index: {}]  }
   0x1   :  { %v4_v0 = vld [vmem:[%s55_s0] sm:$0xf]  ;;  %s36_s0 = smov 72  }
   0x2   :  { %5 = vst [vmem:[#allocation1] sm:$0xf] %v4_v0 }
   0x9   :  { %v10_v1 = vld [vmem:[#allocation1 + $0x3] sm:$0x1]   ;;  %v22_v2 = vld [vmem:[#allocation1 + $0x1] sm:$0x1]   ;;  %v6_v3 = vld [vmem:[#allocation1] sm:$0x1]  }
   0xa   :  { %11 = vrot.lane.b32.xlu0 %v10_v1, %s36_s0  ;;  %23 = vrot.lane.b32.xlu1 %v22_v2, %s37_s8  ;;  %v16_v4 = vld [vmem:[#allocation1 + $0x2] sm:$0x1]   ;;  %8 = vst.msk [vmem:[#allocation0] sm:$0x1] %vm7_vm0, %v6_v3  }
   0xe   :  { %17 = vrot.lane.b32.xlu0 %v16_v4, %s38_s9 }
  0x7c   :  { %v12_v5 = vpop.permute.xlu0 %11   ;;  %v24_v6 = vpop.permute.xlu1 %23  }
  0x7d   :  { %14 = vst.msk [vmem:[#allocation0] sm:$0x1] %vm13_vm1, %v12_v5  }
  0x80   :  { %v18_v7 = vpop.permute.xlu0 %17  }
  0x81   :  { %20 = vst.msk [vmem:[#allocation0] sm:$0x1] %vm19_vm2, %v18_v7  }
  0x82   :  { %26 = vst.msk [vmem:[#allocation0] sm:$0x1] %vm25_vm3, %v24_v6  }
  0x89   :  { %v30_v8 = vld [vmem:[#allocation0] sm:$0x1] }
  0x8a   :  { %32 = vst [vmem:[%s56_s1] sm:$0x1] %v30_v8 }

// kernel: tile.7
= control target key start
LH: loop header
LB: loop body
LE: loop exit
PB: predicated region body
PF: predicated region fallthrough
CT: control target
= control target key end

     0   :  { %s22_s0 = inlined_call_operand.vmem [shape: f32[24], index: 0, kind: input, shape index: {}]   ;;  %s23_s1 = inlined_call_operand.vmem [shape: f32[4,24], index: 1, kind: output, shape index: {}]  }
   0x1   :  { %v4_v0 = vld [vmem:[%s22_s0] ss:$0 sm:$0xff] }
   0x2   :  { %5 = vst [vmem:[%s23_s1] sm:$0xf] %v4_v0 }

// kernel: multi_head_attention_pallas.1
= control target key start
LH: loop header
LB: loop body
LE: loop exit
PB: predicated region body
PF: predicated region fallthrough
CT: control target
= control target key end

     0   :  { %s1375_s21 = smov 0   ;;  %s1505_s0 = inlined_call_operand.vmem [shape: f32[2,8,32], index: 0, kind: input, shape index: {}]   ;;  %s1506_s1 = inlined_call_operand.vmem [shape: f32[8,8], index: 1, kind: input, shape index: {}]   ;;  %s1507_s2 = inlined_call_operand.vmem [shape: f32[32,96], index: 2, kind: input, shape index: {}]   ;;  %s1508_s3 = inlined_call_operand.vmem [shape: f32[1,96], index: 3, kind: input, shape index: {}]   ;;  %s1509_s4 = inlined_call_operand.vmem [shape: f32[32,32], index: 4, kind: input, shape index: {}]   ;;  %s1510_s5 = inlined_call_operand.vmem [shape: f32[1,32], index: 5, kind: input, shape index: {}]   ;;  %s1511_s6 = inlined_call_operand.vmem [shape: f32[2,8,32], index: 6, kind: output, shape index: {}]  }
   0x1 LB: > { %s1149_s22 = sadd.s32 4294967295, %s1321_s21   ;;  %p1153_p0 = scmp.ge.s32.totalorder %s1321_s21, 1  ;;  %s1321_s21 = sphi %s1375_s21, %s16_s21  }
   0x2   : > { %p211_p1 = scmp.lt.s32.totalorder %s1321_s21, 3 }
   0x4   : > { %p212_p2 = pnand %p1153_p0, %p211_p1 }
   0x5   : > { %v248_v0 = vld [vmem:[%s1507_s2] sm:$0xff] (!%p212_p2)  ;;  %v249_v1 = vld [vmem:[%s1507_s2 + $0x8] sm:$0xff] (!%p212_p2)  ;;  %v250_v2 = vld [vmem:[%s1507_s2 + $0x10] sm:$0xff] (!%p212_p2)  ;;  %v1323_v3 = vmov (!%p212_p2), 0.0|0.0   ;;  %vm1324_vm0 = vmmov (!%p212_p2), 0   ;;  %v1325_v6 = vmov (!%p212_p2), 0.0  }
   0x6   : > { %215 = sbr.rel (%p212_p2) target bundleno = 2000 (0x7d0), region = 44  ;;  %1262 = vmatprep.subr.bf16.mxu0 (!%p212_p2), %v1323_v3  ;;  %v1263_v4 = vpack.c.bf16 (!%p212_p2), %v249_v1, %v248_v0  ;;  %v251_v5 = vld [vmem:[%s1507_s2 + $0x18] sm:$0xff] (!%p212_p2)  ;;  %1208 = vmatprep.mubr.msk.f32.mxu0 (!%p212_p2), %vm1324_vm0, %v1325_v6  ;;  %p239_p3 = scmp.lt.s32.totalorder (!%p212_p2), %s1149_s22, 1  ;;  %vm259_vm1 = vcmask (!%p212_p2), 261120   ;;  %v1156_v9 = vld [vmem:[%s1508_s3] ss:$0 sm:$0xff] (!%p212_p2) }
   0x7   : > { %1211 = vmatprep.subr.mxu1 (!%p212_p2), %v1325_v6  ;;  %1213 = vmatprep.mubr.msk.f32.mxu1 (!%p212_p2), %vm1324_vm0, %v1325_v6  ;;  %v1266_v7 = vpack.c.bf16 (!%p212_p2), %v251_v5, %v250_v2  ;;  %s1326_s13 = smov (!%p212_p2), 112   ;;  %s1327_s14 = smov (!%p212_p2), 120   ;;  %vm337_vm2 = vcmask (!%p212_p2), 64512   ;;  %v333_v18 = vld [vmem:[%s1506_s1] sm:$0xff] (!%p212_p2)  ;;  %vm1007_vm3 = vcmask (!%p212_p2), 130048   ;;  %vm1009_vm4 = vcmask (!%p212_p2), 195584  }
   0x8   : > { %1264 = vmatpush3.bf16.msra.mxu0 (!%p212_p2), %v1263_v4  ;;  %s1328_s15 = smov (!%p212_p2), 96   ;;  %s1329_s16 = smov (!%p212_p2), 104  }
   0x9   : > { %1265 = vmatprep.subr.bf16.mxu0 (!%p212_p2), %v1323_v3  ;;  %s1330_s17 = smov (!%p212_p2), 72   ;;  %s1331_s20 = smov (!%p212_p2), 48  }
   0xa   : > { %s1332_s23 = smov (!%p212_p2), 80   ;;  %s1333_s24 = smov (!%p212_p2), 56  }
   0xb   : > { %s1334_s25 = smov (!%p212_p2), 88   ;;  %s1335_s26 = smov (!%p212_p2), 64  }
   0xc   : > { %1267 = vmatpush3.bf16.msra.mxu0 (!%p212_p2), %v1266_v7  ;;  %s1336_s27 = smov (!%p212_p2), 40  }
   0xd   : > { %s1513_s22 = smov (!%p239_p3, %s1149_s22), 1  ;;  %1231 = vmatprep.subr.mxu0 %v1325_v6 }
   0xe   : > { %s1154_s7 = sshll.u32 %s1513_s22, 3 }
   0xf   : > { %s242_s10 = scalar_lea.vmem %s1505_s0, %s1154_s7 }
  0x10   : > { %v247_v8 = vld [vmem:[%s242_s10] sm:$0xff] }
  0x11   : > { %1209 = vmatmul.mubr.msk.f32.vlgmr.msra.gmra.mrb[0].mxu0 %vm259_vm1, %v247_v8 }
  0x12   : > { %1233 = vmatprep.mubr.msk.f32.mxu0 %vm1324_vm0, %v1325_v6 }
  0xe4   : > { %v329_v10 = vpop.f32.mrb[0].mxu0 }
  0xe5   : > { %v1417_v11 = vadd.f32 %v1156_v9, %v329_v10  ;;  %v1210_v12 = vpop.f32.mrb[1].mxu0 }
  0xe7   : > { %423 = vrot.lane.b32.xlu1 %v1417_v11, %s1326_s13  ;;  %335 = vrot.lane.b32.xlu0 %v1417_v11, %s1327_s14  ;;  %s1337_s13 = smov 8   ;;  %s1338_s14 = smov 16  }
  0xeb   : > { %501 = vrot.lane.b32.xlu1 %v1417_v11, %s1328_s15  ;;  %s1339_s15 = smov 24  }
  0xef   : > { %499 = vrot.lane.b32.xlu1 %v1417_v11, %s1329_s16 }
  0xf3   : > { %666 = vrot.lane.b32.xlu1 %v1417_v11, %s1330_s17 }
 0x159   : > { %v424_v13 = vpop.permute.xlu1 %423  ;;  %v336_v14 = vpop.permute.xlu0 %335 }
 0x15a   : > { %1212 = vmatpush3.xpose.msk.msra.mxu1 %vm337_vm2, %v336_v14  ;;  %v1012_v14 = vld [vmem:[%s1509_s4 + $0x8] sm:$0xff] }
 0x15b   : > { %1216 = vmatprep.subr.mxu1 %v1325_v6 }
 0x15d   : > { %v502_v15 = vpop.permute.xlu1 %501  ;;  %1214 = vmatmul.mubr.msk.f32.vlgmr.msra.gmra.mrb[0].mxu1 %vm337_vm2, %v1417_v11 }
 0x15e   : > { %1217 = vmatpush3.msra.mxu1 %v424_v13  ;;  %1218 = vmatprep.mubr.msk.f32.mxu1 %vm1324_vm0, %v1325_v6  ;;  %v1011_v13 = vld [vmem:[%s1509_s4] sm:$0xff] }
 0x15f   : > { %1221 = vmatprep.subr.mxu1 %v1325_v6 }
 0x161   : > { %v500_v16 = vpop.permute.xlu1 %499 }
 0x165   : > { %v667_v17 = vpop.permute.xlu1 %666 }
 0x166   : > { %1232 = vmatpush3.xpose.msk.msra.mxu0 %vm337_vm2, %v667_v17 }
 0x167   : > { %1241 = vmatprep.subr.mxu0 %v1325_v6 }
 0x230   : > { %v408_v19 = vpop.f32.mrb[0].mxu1 }
 0x231   : > { %v409_v20 = vadd.f32 %v408_v19, %v333_v18  ;;  %v1215_v21 = vpop.f32.mrb[1].mxu1 }
 0x233   : > { %v412_v22 = vsel %vm337_vm2, %v409_v20, -inf }
 0x234   : > { %413 = vmax.xlane.f32.xlu0 %v412_v22 }
 0x24a   : > { %831 = vrot.lane.b32.xlu0 %v1417_v11, %s1331_s20  ;;  %s246_s20 = scalar_lea.vmem %s1511_s6, %s1154_s7 }
 0x2c1   : > { %v414_v23 = vpop.xlane.xlu0 %413 }
 0x2c2   : > { %v415_v24 = vsub.f32 %v409_v20, %v414_v23 }
 0x2c4   : > { %v416_v25 = vmul.f32 1.442695, %v415_v24 }
 0x2c5   : > { %v832_v30 = vpop.permute.xlu0 %831 }
 0x2c6   : > { %1299 = vpow2.f32 %v416_v25 }
 0x2d0   : > { %v1300_v26 = vpop.eup %1299 }
 0x2d1   : > { %v418_v27 = vsel %vm337_vm2, %v1300_v26, 0.0 }
 0x2d2   : > { %419 = vadd.xlane.f32.xlu1 %v418_v27 }
 0x2e3   : > { %664 = vrot.lane.b32.xlu1 %v1417_v11, %s1332_s23 }
 0x2e7   : > { %829 = vrot.lane.b32.xlu1 %v1417_v11, %s1333_s24 }
 0x35f   : > { %v420_v28 = vpop.xlane.xlu1 %419 }
 0x360   : > { %1301 = vrcp.f32 %v420_v28 }
 0x363   : > { %v665_v29 = vpop.permute.xlu1 %664 }
 0x364   : > { %1234 = vmatmul.mubr.msk.f32.vlgmr.msra.gmra.mrb[2].mxu0 %vm337_vm2, %v665_v29  ;;  %v1170_v29 = vld [vmem:[%s1510_s5] ss:$0 sm:$0xff] }
 0x365   : > { %1242 = vmatpush3.xpose.msk.msra.mxu0 %vm337_vm2, %v832_v30  ;;  %1243 = vmatprep.mubr.msk.f32.mxu0 %vm1324_vm0, %v1325_v6 }
 0x366   : > { %1268 = vmatprep.subr.bf16.mxu0 %v1323_v3 }
 0x367   : > { %v830_v31 = vpop.permute.xlu1 %829 }
 0x368   : > { %1244 = vmatmul.mubr.msk.f32.vlgmr.msra.gmra.mrb[4].mxu0 %vm337_vm2, %v830_v31 }
 0x369   : > { %1259 = vmatprep.mubr.msk.f32.mxu0 %vm1324_vm0, %v1325_v6 }
 0x36a   : > { %v1302_v32 = vpop.eup %1301 }
 0x36b   : > { %v422_v33 = vmul.f32 %v1302_v32, %v1300_v26 }
 0x36d   : > { %1219 = vmatmul.mubr.msk.f32.vlgmr.msra.gmra.mrb[2].mxu1 %vm337_vm2, %v422_v33 }
 0x36e   : > { %1222 = vmatpush3.xpose.msk.msra.mxu1 %vm337_vm2, %v502_v15  ;;  %1223 = vmatprep.mubr.msk.f32.mxu1 %vm1324_vm0, %v1325_v6  ;;  %v1269_v15 = vpack.c.bf16 %v1012_v14, %v1011_v13 }
 0x36f   : > { %1226 = vmatprep.subr.mxu1 %v1325_v6 }
 0x370   : > { %1270 = vmatpush3.bf16.msra.mxu0 %v1269_v15 }
 0x371   : > { %1224 = vmatmul.mubr.msk.f32.vlgmr.msra.gmra.mrb[4].mxu1 %vm337_vm2, %v500_v16  ;;  %1271 = vmatprep.subr.bf16.mxu0 %v1323_v3  ;;  %v1013_v16 = vld [vmem:[%s1509_s4 + $0x10] sm:$0xff] }
 0x372   : > { %1228 = vmatprep.mubr.msk.f32.mxu1 %vm1324_vm0, %v1325_v6 }
 0x437   : > { %v738_v34 = vpop.f32.mrb[2].mxu0 }
 0x438   : > { %v739_v35 = vadd.f32 %v738_v34, %v333_v18  ;;  %v1235_v36 = vpop.f32.mrb[3].mxu0 }
 0x43a   : > { %v742_v37 = vsel %vm337_vm2, %v739_v35, -inf }
 0x43b   : > { %743 = vmax.xlane.f32.xlu0 %v742_v37  ;;  %v903_v38 = vpop.f32.mrb[4].mxu0 }
 0x43c   : > { %v1245_v39 = vpop.f32.mrb[5].mxu0  ;;  %v904_v45 = vadd.f32 %v903_v38, %v333_v18 }
 0x43e   : > { %v907_v47 = vsel %vm337_vm2, %v904_v45, -inf }
 0x440   : > { %v1458_v40 = vpop.f32.mrb[2].mxu1 }
 0x441   : > { %v1220_v41 = vpop.f32.mrb[3].mxu1 }
 0x444   : > { %v573_v42 = vpop.f32.mrb[4].mxu1 }
 0x445   : > { %v574_v43 = vadd.f32 %v573_v42, %v333_v18  ;;  %v1225_v44 = vpop.f32.mrb[5].mxu1 }
 0x447   : > { %v577_v46 = vsel %vm337_vm2, %v574_v43, -inf }
 0x448   : > { %578 = vmax.xlane.f32.xlu1 %v577_v46 }
 0x44c   : > { %908 = vmax.xlane.f32.xlu1 %v907_v47 }
 0x4c8   : > { %v744_v48 = vpop.xlane.xlu0 %743 }
 0x4c9   : > { %v745_v49 = vsub.f32 %v739_v35, %v744_v48 }
 0x4cb   : > { %v746_v50 = vmul.f32 1.442695, %v745_v49 }
 0x4cd   : > { %1303 = vpow2.f32 %v746_v50 }
 0x4d5   : > { %v579_v51 = vpop.xlane.xlu1 %578 }
 0x4d6   : > { %v580_v59 = vsub.f32 %v574_v43, %v579_v51 }
 0x4d7   : > { %v1304_v52 = vpop.eup %1303 }
 0x4d8   : > { %v748_v53 = vsel %vm337_vm2, %v1304_v52, 0.0  ;;  %v581_v60 = vmul.f32 1.442695, %v580_v59 }
 0x4d9   : > { %749 = vadd.xlane.f32.xlu1 %v748_v53  ;;  %v909_v54 = vpop.xlane.xlu1 %908 }
 0x4da   : > { %v910_v55 = vsub.f32 %v904_v45, %v909_v54 }
 0x4dc   : > { %v911_v56 = vmul.f32 1.442695, %v910_v55 }
 0x4de   : > { %1305 = vpow2.f32 %v911_v56 }
 0x4df   : > { %1307 = vpow2.f32 %v581_v60 }
 0x4e8   : > { %v1306_v57 = vpop.eup %1305 }
 0x4e9   : > { %v913_v58 = vsel %vm337_vm2, %v1306_v57, 0.0  ;;  %v1308_v61 = vpop.eup %1307 }
 0x4ea   : > { %588 = vrot.lane.b32.xlu1 %v1417_v11, %s1334_s25  ;;  %914 = vadd.xlane.f32.xlu0 %v913_v58  ;;  %v583_v62 = vsel %vm337_vm2, %v1308_v61, 0.0 }
 0x500   : > { %753 = vrot.lane.b32.xlu0 %v1417_v11, %s1335_s26 }
 0x50e   : > { %584 = vadd.xlane.f32.xlu1 %v583_v62 }
 0x51f   : > { %918 = vrot.lane.b32.xlu1 %v1417_v11, %s1336_s27 }
 0x566   : > { %v750_v63 = vpop.xlane.xlu1 %749 }
 0x56a   : > { %v589_v0 = vpop.permute.xlu1 %588 }
 0x56b   : > { %1227 = vmatpush3.msra.mxu1 %v589_v0 }
 0x56c   : > { %1236 = vmatprep.subr.mxu1 %v1325_v6 }
 0x577   : > { %v915_v2 = vpop.xlane.xlu0 %914 }
 0x57b   : > { %v754_v8 = vpop.permute.xlu0 %753 }
 0x59b   : > { %v585_v1 = vpop.xlane.xlu1 %584 }
 0x59c   : > { %1309 = vrcp.f32 %v585_v1 }
 0x59d   : > { %1311 = vrcp.f32 %v750_v63 }
 0x59e   : > { %1313 = vrcp.f32 %v915_v2 }
 0x59f   : > { %v919_v11 = vpop.permute.xlu1 %918 }
 0x5a6   : > { %v1310_v4 = vpop.eup %1309 }
 0x5a7   : > { %v587_v5 = vmul.f32 %v1310_v4, %v1308_v61  ;;  %v1312_v7 = vpop.eup %1311 }
 0x5a8   : > { %v752_v9 = vmul.f32 %v1312_v7, %v1304_v52  ;;  %v1314_v10 = vpop.eup %1313 }
 0x5a9   : > { %1229 = vmatmul.mubr.msk.f32.vlgmr.msra.gmra.mrb[6].mxu1 %vm337_vm2, %v587_v5  ;;  %v917_v12 = vmul.f32 %v1314_v10, %v1306_v57 }
 0x5aa   : > { %1237 = vmatpush3.msra.mxu1 %v754_v8  ;;  %1238 = vmatprep.mubr.msk.f32.mxu1 %vm1324_vm0, %v1325_v6 }
 0x5ab   : > { %1246 = vmatprep.subr.mxu1 %v1325_v6 }
 0x5ad   : > { %1239 = vmatmul.mubr.msk.f32.vlgmr.msra.gmra.mrb[8].mxu1 %vm337_vm2, %v752_v9 }
 0x5ae   : > { %1247 = vmatpush3.msra.mxu1 %v919_v11  ;;  %1248 = vmatprep.mubr.msk.f32.mxu1 %vm1324_vm0, %v1325_v6  ;;  %v1014_v6 = vld [vmem:[%s1509_s4 + $0x18] sm:$0xff] }
 0x5af   : > { %v1272_v17 = vpack.c.bf16 %v1014_v6, %v1013_v16 }
 0x5b1   : > { %1249 = vmatmul.mubr.msk.f32.vlgmr.msra.gmra.mrb[10].mxu1 %vm337_vm2, %v917_v12  ;;  %1273 = vmatpush3.bf16.msra.mxu0 %v1272_v17 }
 0x67c   : > { %v660_v18 = vpop.f32.mrb[6].mxu1 }
 0x67d   : > { %995 = vrot.lane.b32.xlu1 %v660_v18, %s1337_s13  ;;  %v1230_v19 = vpop.f32.mrb[7].mxu1 }
 0x680   : > { %v825_v20 = vpop.f32.mrb[8].mxu1 }
 0x681   : > { %999 = vrot.lane.b32.xlu0 %v825_v20, %s1338_s14  ;;  %v1240_v21 = vpop.f32.mrb[9].mxu1 }
 0x684   : > { %v990_v3 = vpop.f32.mrb[10].mxu1 }
 0x685   : > { %1003 = vrot.lane.b32.xlu1 %v990_v3, %s1339_s15  ;;  %v1250_v22 = vpop.f32.mrb[11].mxu1 }
 0x6ef   : > { %v996_v23 = vpop.permute.xlu1 %995 }
 0x6f0   : > { %v1006_v25 = vsel %vm337_vm2, %v1458_v40, %v996_v23 }
 0x6f3   : > { %v1000_v24 = vpop.permute.xlu0 %999 }
 0x6f4   : > { %v1008_v26 = vsel %vm1007_vm3, %v1006_v25, %v1000_v24 }
 0x6f7   : > { %v1004_v27 = vpop.permute.xlu1 %1003 }
 0x6f8   : > { %v1010_v28 = vsel %vm1009_vm4, %v1008_v26, %v1004_v27 }
 0x6f9   : > { %1260 = vmatmul.mubr.msk.f32.vlgmr.msra.gmra.mrb[6].mxu0 %vm259_vm1, %v1010_v28 }
 0x7cc   : > { %v1091_v30 = vpop.f32.mrb[6].mxu0 }
 0x7cd   : > { %v1092_v31 = vadd.f32 %v1170_v29, %v1091_v30  ;;  %v1261_v32 = vpop.f32.mrb[7].mxu0 }
 0x7cf   : > { %1095 = vst.msk [vmem:[%s246_s20] sm:$0xff] %vm259_vm1, %v1092_v31 }
 0x7d0 PF: > { %s16_s21 = sadd.s32 1, %s1321_s21  }
 0x7d1   : > { %p13_p4 = scmp.ge.s32.totalorder %s16_s21, 4  }
 0x7d3   :  { %15 = sbr.rel (!%p13_p4) target bundleno = 1 (0x1), region = 74 }

</bundles_post_ra>
